<compile_context>
chip_gen: v7x
topology: tpu7x:2x2x1
jax: 0.10.0
libtpu: 0.0.40
codegen_flags: <defaults>
</compile_context>

<pallas_src>
import jax
import jax.numpy as jnp
from jax.experimental import pallas as pl
from jax.experimental.pallas import tpu as pltpu


# ----------------------------------------------------------------------------
# Kernel: transposed, relation-collapsed aggregation
#   out_T[:, rows] = init_T[:, rows] + inv_deg[rows] * (msg_T @ adj_T[:, rows])
# grid = (N//tm, K//tk), K = R*N.  The (D, tm) f32 output block has a constant
# index_map along k, so it stays resident in VMEM and doubles as the
# accumulator; the exact f32 normalization + self-loop/bias land in the
# k == last epilogue.
# ----------------------------------------------------------------------------
def _rgcn_agg_kernel(msg_ref, adj_ref, init_ref, invdeg_ref, out_ref):
    k = pl.program_id(1)

    @pl.when(k == 0)
    def _zero():
        out_ref[...] = jnp.zeros_like(out_ref)

    # int8 {0,1} mask -> bf16 rides the VPU slot; bf16 x bf16 -> f32 on the MXU.
    adj = adj_ref[...].astype(jnp.bfloat16)
    out_ref[...] += jnp.dot(msg_ref[...], adj, preferred_element_type=jnp.float32)

    @pl.when(k == pl.num_programs(1) - 1)
    def _finalize():
        # Exact f32 1/in_degree (lane-wise broadcast over D sublanes) + self-loop/bias.
        out_ref[...] = init_ref[...] + out_ref[...] * invdeg_ref[...]


def _vmem_budget_bytes():
    # Generation-aware budget: 128 MiB parts (v5e/v6e) vs 64 MiB (v7x).
    # Request ~75% of capacity, never the full part.
    try:
        cap = int(pltpu.get_tpu_info().vmem_capacity_bytes)
    except Exception:  # pragma: no cover - fall back to a v7x-safe value
        cap = 64 * 1024 * 1024
    return max(32 * 1024 * 1024, (cap * 3) // 4)


def _largest_divisor_tile(total, cap, multiple):
    """Largest multiple of `multiple` that divides `total` and is <= cap,
    falling back to the full extent (always a legal block dim)."""
    cap = min(cap, total)
    t = (cap // multiple) * multiple
    while t >= multiple:
        if total % t == 0:
            return t
        t -= multiple
    return total


def rgcn_aggregate_t(msg_t, adj_t, init_t, inv_deg, *, tm=None, tk=None):
    """msg_t: (D, K) bf16, adj_t: (K, N) int8 0/1 mask, init_t: (D, N) f32,
    inv_deg: (1, N) f32  ->  (D, N) f32 transposed embeddings."""
    D, K = msg_t.shape
    N = adj_t.shape[1]
    budget = _vmem_budget_bytes()

    # Row tile: lane-dense (multiple of 128).  Guarantee >= 2 row tiles when
    # possible so the v7x megacore split over the "parallel" axis has work.
    if tm is None or N % tm != 0:
        tm = _largest_divisor_tile(N, 512, 128)
        if N // tm < 2 and tm % 256 == 0:
            tm //= 2
    tm = min(tm, N)

    # Contraction tile over K = R*N, sized from the padding-aware VMEM footprint
    # (all blocks are lane-dense, so bytes are what they look like).
    if tk is None or K % tk != 0:
        per_tk = 2 * tm * 1 + 2 * D * 2                 # dbl-buffered adj int8 + msg bf16
        fixed = 4 * D * tm * 4 + 2 * 8 * tm * 4 + (1 << 20)
        tk_cap = max(128, (budget - fixed) // per_tk)
        tk = _largest_divisor_tile(K, tk_cap, 128)
    tk = min(tk, K)

    need = (2 * tk * tm                  # adj int8, double-buffered
            + 2 * D * tk * 2             # msg bf16, double-buffered
            + 2 * D * tm * 4             # init f32
            + 2 * D * tm * 4             # out f32 accumulator
            + 2 * 8 * tm * 4)            # inv_deg (1 row pads to 8 sublanes)
    vmem_limit = int(min(budget, max(2 * need + (2 << 20), 32 * 1024 * 1024)))

    return pl.pallas_call(
        _rgcn_agg_kernel,
        out_shape=jax.ShapeDtypeStruct((D, N), jnp.float32),
        grid_spec=pltpu.PrefetchScalarGridSpec(
            num_scalar_prefetch=0,
            grid=(N // tm, K // tk),
            in_specs=[
                pl.BlockSpec((D, tk), lambda i, k: (0, k)),    # msg_T slab
                pl.BlockSpec((tk, tm), lambda i, k: (k, i)),   # int8 mask tile
                pl.BlockSpec((D, tm), lambda i, k: (0, i)),    # self-loop + bias
                pl.BlockSpec((1, tm), lambda i, k: (0, i)),    # exact 1/in_degree
            ],
            out_specs=pl.BlockSpec((D, tm), lambda i, k: (0, i)),
        ),
        compiler_params=pltpu.CompilerParams(
            dimension_semantics=("parallel", "arbitrary"),
            vmem_limit_bytes=vmem_limit,
        ),
    )(msg_t, adj_t, init_t, inv_deg)


# ----------------------------------------------------------------------------
# One-time graph preprocessing (outside the jit'd training step)
# ----------------------------------------------------------------------------
def prepare_graph(adj_mask, in_deg):
    """adj_mask: (R, N, N) {0,1} with adj_mask[r, v, u] = 1 for edge u -> v.
    in_deg: (N,) total in-degree used for the DGL-style 1/in_deg message norm.
    Returns (adj_t int8 (R*N, N), inv_deg f32 (1, N))."""
    R, N, _ = adj_mask.shape
    adj_t = jnp.transpose(adj_mask, (0, 2, 1)).reshape(R * N, N).astype(jnp.int8)
    inv_deg = (1.0 / jnp.maximum(in_deg, 1.0)).reshape(1, N).astype(jnp.float32)
    return adj_t, inv_deg


# ----------------------------------------------------------------------------
# LinkPredict forward / scoring / loss (glue in plain JAX, hot path in Pallas)
# ----------------------------------------------------------------------------
def link_predict_forward(params, node_id, adj_t, inv_deg, *, tm=None, tk=None):
    # EmbeddingLayer: gather node embeddings (XLA gather; no Pallas win here).
    h0 = params["embedding"][node_id]                                    # (N, D)
    N = h0.shape[0]
    # Basis decomposition: W[r] = sum_b comp[r, b] * V[b]
    w_rel = jnp.einsum("rb,bij->rij", params["comp"], params["bases"])   # (R, D, D)
    R, D, _ = w_rel.shape

    # Hoisted per-relation feature transform, produced directly in the
    # transposed (lane-dense) layout the kernel consumes:
    #   msg_t[d, r*N + u] = (h0 @ W[r])[u, d]
    msg_t = jnp.einsum("ue,red->dru", h0, w_rel).reshape(D, R * N)
    init_t = (h0 @ params["w_self"] + params["bias"]).T                  # (D, N)

    out_t = rgcn_aggregate_t(
        msg_t.astype(jnp.bfloat16),        # only bf16 rounding left in the pipeline
        adj_t,                             # cached int8 mask, converted once
        init_t.astype(jnp.float32),
        inv_deg,
        tm=tm, tk=tk,
    )
    return out_t.T                                                       # (N, D) f32


def calc_score(params, embedding, triplets):
    # DistMult score.  At small T the gather+mul+reduce fuses cleanly in XLA;
    # a dedicated pallas_call (lane-width-1 output) is pure launch overhead.
    s = embedding[triplets[:, 0]]
    r = params["w_relation"][triplets[:, 1]]
    o = embedding[triplets[:, 2]]
    return jnp.sum(s * r * o, axis=1)


def get_loss(params, node_id, adj_t, inv_deg, triplets, labels, reg_param,
             *, tm=None, tk=None):
    embedding = link_predict_forward(params, node_id, adj_t, inv_deg, tm=tm, tk=tk)
    score = calc_score(params, embedding, triplets)
    # binary_cross_entropy_with_logits
    predict_loss = jnp.mean(
        jnp.maximum(score, 0.0) - score * labels + jnp.log1p(jnp.exp(-jnp.abs(score)))
    )
    reg_loss = jnp.mean(embedding ** 2) + jnp.mean(params["w_relation"] ** 2)
    return predict_loss + reg_param * reg_loss, embedding, score


# ----------------------------------------------------------------------------
# Pure-JAX f32 reference for the RGCN layer (correctness check)
# ----------------------------------------------------------------------------
def _reference_layer(h, adj_norm, w_rel, w_self, bias):
    out = h @ w_self + bias
    for r in range(adj_norm.shape[0]):
        out = out + adj_norm[r] @ (h @ w_rel[r])
    return out


if __name__ == "__main__":
    key = jax.random.PRNGKey(0)

    num_nodes = 256       # N  (exercises row tiling with tm=128 -> 2 row tiles)
    h_dim = 32            # D
    num_rels = 4          # LinkPredict arg; RGCN sees num_rels * 2 relation types
    num_bases = 2
    num_rel_types = num_rels * 2
    num_triplets = 16
    reg_param = 0.01

    k = jax.random.split(key, 8)

    # Parameters (deterministic, xavier-style where the module does so)
    relu_gain = jnp.sqrt(2.0)
    wrel_bound = relu_gain * jnp.sqrt(6.0 / (num_rels + h_dim))
    params = {
        "embedding": jax.random.normal(k[0], (num_nodes, h_dim), jnp.float32),
        "bases": jax.random.normal(k[1], (num_bases, h_dim, h_dim), jnp.float32)
                 * jnp.sqrt(2.0 / (h_dim + h_dim)),
        "comp": jax.random.normal(k[2], (num_rel_types, num_bases), jnp.float32),
        "w_self": jax.random.normal(k[3], (h_dim, h_dim), jnp.float32)
                  * jnp.sqrt(2.0 / (h_dim + h_dim)),
        "bias": jnp.zeros((1, h_dim), jnp.float32),
        "w_relation": jax.random.uniform(
            k[4], (num_rels, h_dim), jnp.float32, -wrel_bound, wrel_bound),
    }

    # Synthetic graph: for each relation type r, edge ((v*3 + r) % N) -> v,
    # so every node has in-degree num_rel_types; norm = 1 / in_degree.
    node_id = jnp.arange(num_nodes, dtype=jnp.int32)
    dst = jnp.arange(num_nodes)
    adj_mask = jnp.zeros((num_rel_types, num_nodes, num_nodes), jnp.float32)
    for r in range(num_rel_types):
        src = (dst * 3 + r) % num_nodes
        adj_mask = adj_mask.at[r, dst, src].add(1.0)
    in_deg = jnp.sum(adj_mask, axis=(0, 2))                        # (N,)
    adj_norm = adj_mask / jnp.maximum(in_deg, 1.0)[None, :, None]  # f32 reference adj
    # TODO(synk): DGL's RGCN typically normalizes by per-relation in-degree; the
    # summed-over-relations normalization here is a harness choice only.

    # One-time graph preprocessing (outside the jit'd step): int8 mask + exact norm.
    adj_t, inv_deg = prepare_graph(adj_mask, in_deg)

    # Synthetic triplets (head, relation, tail) and labels
    triplets = jnp.stack(
        [
            jax.random.randint(k[5], (num_triplets,), 0, num_nodes),
            jax.random.randint(k[6], (num_triplets,), 0, num_rels),
            jax.random.randint(k[7], (num_triplets,), 0, num_nodes),
        ],
        axis=1,
    ).astype(jnp.int32)
    labels = (jax.random.uniform(k[5], (num_triplets,)) > 0.5).astype(jnp.float32)

    # Jitted training-step forward: the cached int8 adjacency is just an input,
    # never re-cast per call.
    @jax.jit
    def train_step(p, nid, at, idg, trip, lab):
        return get_loss(p, nid, at, idg, trip, lab, reg_param)

    loss, embedding, score = train_step(params, node_id, adj_t, inv_deg,
                                        triplets, labels)
    jax.block_until_ready((loss, embedding, score))

    # Correctness check against pure-f32 JAX reference.  The only reduced
    # precision left is the bf16 msg stream (normalization is exact f32 now).
    w_rel = jnp.einsum("rb,bij->rij", params["comp"], params["bases"])
    emb_ref = _reference_layer(params["embedding"][node_id], adj_norm, w_rel,
                               params["w_self"], params["bias"])
    score_ref = jnp.sum(
        emb_ref[triplets[:, 0]]
        * params["w_relation"][triplets[:, 1]]
        * emb_ref[triplets[:, 2]],
        axis=1,
    )
    assert jnp.allclose(embedding, emb_ref, atol=1e-2, rtol=2e-2)
    assert jnp.allclose(score, score_ref, atol=1e-1, rtol=5e-2)
    assert jnp.isfinite(loss)

    print("KERNEL_OK")
</pallas_src>

<mosaic_0001>
module attributes {stable_mosaic.version = 11 : i64} {
  func.func @_rgcn_agg_kernel(%arg0: i32, %arg1: i32, %arg2: memref<32x2048xbf16, #tpu.memory_space<vmem>>, %arg3: memref<2048x128xi8, #tpu.memory_space<vmem>>, %arg4: memref<32x128xf32, #tpu.memory_space<vmem>>, %arg5: memref<1x128xf32, #tpu.memory_space<vmem>>, %arg6: memref<32x128xf32, #tpu.memory_space<vmem>>) attributes {dimension_semantics = [#tpu.dimension_semantics<parallel>, #tpu.dimension_semantics<arbitrary>], iteration_bounds = array<i64: 2, 1>, scalar_prefetch = 0 : i64, scratch_operands = 0 : i64, tpu.core_type = #tpu.core_type<tc>, window_params = [{transform_indices = @transform_0, window_bounds = array<i64: 32, 2048>}, {transform_indices = @transform_1, window_bounds = array<i64: 2048, 128>}, {transform_indices = @transform_2, window_bounds = array<i64: 32, 128>}, {transform_indices = @transform_3, window_bounds = array<i64: 1, 128>}, {transform_indices = @transform_4, window_bounds = array<i64: 32, 128>}]} {
    %c0_i32 = arith.constant 0 : i32
    %0 = arith.cmpi eq, %arg1, %c0_i32 : i32
    %1 = arith.extui %0 : i1 to i32
    %c0_i32_0 = arith.constant 0 : i32
    %2 = arith.cmpi ne, %1, %c0_i32_0 : i32
    scf.if %2 {
      %cst_10 = arith.constant 0.000000e+00 : f32
      %13 = vector.broadcast %cst_10 : f32 to vector<32x128xf32>
      %c0_11 = arith.constant 0 : index
      %c0_12 = arith.constant 0 : index
      %14 = vector.load %arg6[%c0_11, %c0_12] : memref<32x128xf32, #tpu.memory_space<vmem>>, vector<32x128xf32>
      tpu.vector_store %arg6[%c0_11, %c0_12], %13 {strides = array<i32>} : memref<32x128xf32, #tpu.memory_space<vmem>>, vector<32x128xf32>,
    } else {
    }
    %c0 = arith.constant 0 : index
    %c0_1 = arith.constant 0 : index
    %3 = vector.load %arg3[%c0, %c0_1] : memref<2048x128xi8, #tpu.memory_space<vmem>>, vector<2048x128xi8>
    %4 = arith.sitofp %3 : vector<2048x128xi8> to vector<2048x128xbf16>
    %c0_2 = arith.constant 0 : index
    %c0_3 = arith.constant 0 : index
    %5 = vector.load %arg6[%c0_2, %c0_3] : memref<32x128xf32, #tpu.memory_space<vmem>>, vector<32x128xf32>
    %c0_4 = arith.constant 0 : index
    %c0_5 = arith.constant 0 : index
    %6 = vector.load %arg2[%c0_4, %c0_5] : memref<32x2048xbf16, #tpu.memory_space<vmem>>, vector<32x2048xbf16>
    %cst = arith.constant dense<0.000000e+00> : vector<32x128xf32>
    %7 = tpu.matmul %6, %4, %cst {dimension_numbers = #tpu.dot_dimension_numbers<[1], [0], [0], [1], [0, 0, 1, 1], [], []>} : vector<32x2048xbf16>, vector<2048x128xbf16>, vector<32x128xf32> -> vector<32x128xf32>
    %8 = arith.addf %5, %7 : vector<32x128xf32>
    %c0_6 = arith.constant 0 : index
    %c0_7 = arith.constant 0 : index
    %9 = vector.load %arg6[%c0_6, %c0_7] : memref<32x128xf32, #tpu.memory_space<vmem>>, vector<32x128xf32>
    tpu.vector_store %arg6[%c0_6, %c0_7], %8 {strides = array<i32>} : memref<32x128xf32, #tpu.memory_space<vmem>>, vector<32x128xf32>,
    %c0_i32_8 = arith.constant 0 : i32
    %10 = arith.cmpi eq, %arg1, %c0_i32_8 : i32
    %11 = arith.extui %10 : i1 to i32
    %c0_i32_9 = arith.constant 0 : i32
    %12 = arith.cmpi ne, %11, %c0_i32_9 : i32
    scf.if %12 {
      %c0_10 = arith.constant 0 : index
      %c0_11 = arith.constant 0 : index
      %13 = vector.load %arg4[%c0_10, %c0_11] : memref<32x128xf32, #tpu.memory_space<vmem>>, vector<32x128xf32>
      %c0_12 = arith.constant 0 : index
      %c0_13 = arith.constant 0 : index
      %14 = vector.load %arg6[%c0_12, %c0_13] : memref<32x128xf32, #tpu.memory_space<vmem>>, vector<32x128xf32>
      %c0_14 = arith.constant 0 : index
      %c0_15 = arith.constant 0 : index
      %15 = vector.load %arg5[%c0_14, %c0_15] : memref<1x128xf32, #tpu.memory_space<vmem>>, vector<1x128xf32>
      %16 = vector.broadcast %15 : vector<1x128xf32> to vector<32x128xf32>
      %17 = arith.mulf %14, %16 : vector<32x128xf32>
      %18 = arith.addf %13, %17 : vector<32x128xf32>
      %c0_16 = arith.constant 0 : index
      %c0_17 = arith.constant 0 : index
      %19 = vector.load %arg6[%c0_16, %c0_17] : memref<32x128xf32, #tpu.memory_space<vmem>>, vector<32x128xf32>
      tpu.vector_store %arg6[%c0_16, %c0_17], %18 {strides = array<i32>} : memref<32x128xf32, #tpu.memory_space<vmem>>, vector<32x128xf32>,
    } else {
    }
    return
  }
  func.func @transform_0(%arg0: i32, %arg1: i32) -> (i32, i32) {
    %c0_i32 = arith.constant 0 : i32
    %c0_i32_0 = arith.constant 0 : i32
    return %c0_i32, %arg1 : i32, i32
  }
  func.func @transform_1(%arg0: i32, %arg1: i32) -> (i32, i32) {
    %c0_i32 = arith.constant 0 : i32
    return %arg1, %arg0 : i32, i32
  }
  func.func @transform_2(%arg0: i32, %arg1: i32) -> (i32, i32) {
    %c0_i32 = arith.constant 0 : i32
    %c0_i32_0 = arith.constant 0 : i32
    return %c0_i32, %arg0 : i32, i32
  }
  func.func @transform_3(%arg0: i32, %arg1: i32) -> (i32, i32) {
    %c0_i32 = arith.constant 0 : i32
    %c0_i32_0 = arith.constant 0 : i32
    return %c0_i32, %arg0 : i32, i32
  }
  func.func @transform_4(%arg0: i32, %arg1: i32) -> (i32, i32) {
    %c0_i32 = arith.constant 0 : i32
    %c0_i32_0 = arith.constant 0 : i32
    return %c0_i32, %arg0 : i32, i32
  }
}

</mosaic_0001>

<bundles_post_ra>
// kernel: train_step.1
= control target key start
LH: loop header
LB: loop body
LE: loop exit
PB: predicated region body
PF: predicated region fallthrough
CT: control target
= control target key end

     0   :  { %s1967_s15 = smov 0   ;;  %s1969_s16 = smov 0   ;;  %s2419_s0 = inlined_call_operand.vmem [shape: bf16[32,2048], index: 0, kind: input, shape index: {}]   ;;  %s2420_s1 = inlined_call_operand.vmem [shape: s8[2048,256], index: 1, kind: input, shape index: {}]   ;;  %s2421_s2 = inlined_call_operand.vmem [shape: f32[32,256], index: 2, kind: input, shape index: {}]   ;;  %s2422_s3 = inlined_call_operand.vmem [shape: f32[1,256], index: 3, kind: input, shape index: {}]   ;;  %s2423_s4 = inlined_call_operand.vmem [shape: f32[32,256], index: 4, kind: output, shape index: {}]  }
   0x1   :  { %s1971_s17 = smov 0   ;;  %s1973_s18 = smov 0  }
   0x2   :  { %s1975_s19 = smov 0  }
   0x3 LB: > { %s26_s20 = sadd.s32 1, %s1936_s18  ;;  %s1587_s21 = sadd.s32 4294967295, %s1940_s19   ;;  %s1940_s19 = sphi %s1975_s19, %s14_s19   ;;  %s1936_s18 = sphi %s1973_s18, %s2429_s18   ;;  %s1932_s17 = sphi %s1971_s17, %s2428_s17   ;;  %s1928_s16 = sphi %s1969_s16, %s2427_s16   ;;  %s1924_s15 = sphi %s1967_s15, %s2426_s15  }
   0x4   : > { %p28_p0 = scmp.ge.s32.totalorder %s26_s20, 2  ;;  %p68_p1 = scmp.ne.s32.totalorder %s1928_s16, %s1924_s15 }
   0x5   : > { %p69_p2 = scmp.eq.s32.totalorder %s1940_s19, 0  ;;  %p150_p4 = scmp.eq.s32.totalorder %s1587_s21, 1 }
   0x6   : > { %s2431_s20 = smov (%p28_p0, %s26_s20), 0  ;;  %s61_s24 = sadd.s32 1, %s1928_s16 }
   0x7   : > { %p1999_p3 = por %p69_p2, %p68_p1  ;;  %s57_s23 = ssub.s32 %s1936_s18, %s2431_s20 }
   0x8   : > { %p59_p5 = scmp.eq.s32.totalorder %s57_s23, 0  ;;  %p2006_p6 = por %p150_p4, %p68_p1 }
   0x9   : > { %p1591_p7 = scmp.ge.s32.totalorder %s1940_s19, 2 }
   0xa   : > { %s2011_s26 = scalar_select %p59_p5, %s1928_s16, %s61_s24  }
   0xb   : > { %181 = sbr.rel (%p1591_p7) target bundleno = 61 (0x3d), region = 20 }
  0x12   : > { %184 = sbr.rel (!%p1999_p3) target bundleno = 54 (0x36), region = 24  ;;  %s186_s27 = sand.u32 (%p1999_p3), 1, %s1928_s16  }
  0x13   : > { %s1593_s28 = sshll.u32 (%p1999_p3), %s1936_s18, 3  ;;  %s1592_s29 = sshll.u32 (%p1999_p3), %s186_s27, 9 }
  0x14   : > { %s2021_s6 = scalar_lea.vmem (%p1999_p3), %s2420_s1, %s1593_s28  ;;  %s2026_s7 = scalar_lea.vmem (%p1999_p3), [#allocation2], %s1592_s29 }
  0x15   : > { %v347_v0 = vld [vmem:[%s2021_s6] sm:$0xff] (%p1999_p3)  ;;  %v349_v1 = vld [vmem:[%s2021_s6 + $0x10] sm:$0xff] (%p1999_p3) }
  0x16   : > { %v351_v2 = vld [vmem:[%s2021_s6 + $0x20] sm:$0xff] (%p1999_p3)  ;;  %348 = vst [vmem:[%s2026_s7] sm:$0xff] (%p1999_p3), %v347_v0  ;;  %350 = vst [vmem:[%s2026_s7 + $0x8] sm:$0xff] (%p1999_p3), %v349_v1  ;;  %v353_v3 = vld [vmem:[%s2021_s6 + $0x30] sm:$0xff] (%p1999_p3) }
  0x17   : > { %352 = vst [vmem:[%s2026_s7 + $0x10] sm:$0xff] (%p1999_p3), %v351_v2  ;;  %v355_v4 = vld [vmem:[%s2021_s6 + $0x40] sm:$0xff] (%p1999_p3)  ;;  %v357_v5 = vld [vmem:[%s2021_s6 + $0x50] sm:$0xff] (%p1999_p3)  ;;  %354 = vst [vmem:[%s2026_s7 + $0x18] sm:$0xff] (%p1999_p3), %v353_v3 }
  0x18   : > { %356 = vst [vmem:[%s2026_s7 + $0x20] sm:$0xff] (%p1999_p3), %v355_v4  ;;  %358 = vst [vmem:[%s2026_s7 + $0x28] sm:$0xff] (%p1999_p3), %v357_v5  ;;  %v359_v6 = vld [vmem:[%s2021_s6 + $0x60] sm:$0xff] (%p1999_p3)  ;;  %v361_v7 = vld [vmem:[%s2021_s6 + $0x70] sm:$0xff] (%p1999_p3) }
  0x19   : > { %v363_v8 = vld [vmem:[%s2021_s6 + $0x80] sm:$0xff]  ;;  %360 = vst [vmem:[%s2026_s7 + $0x30] sm:$0xff] %v359_v6  ;;  %362 = vst [vmem:[%s2026_s7 + $0x38] sm:$0xff] %v361_v7  ;;  %v365_v9 = vld [vmem:[%s2021_s6 + $0x90] sm:$0xff] }
  0x1a   : > { %364 = vst [vmem:[%s2026_s7 + $0x40] sm:$0xff] %v363_v8  ;;  %v367_v10 = vld [vmem:[%s2021_s6 + $0xa0] sm:$0xff]  ;;  %v369_v11 = vld [vmem:[%s2021_s6 + $0xb0] sm:$0xff]  ;;  %366 = vst [vmem:[%s2026_s7 + $0x48] sm:$0xff] %v365_v9 }
  0x1b   : > { %368 = vst [vmem:[%s2026_s7 + $0x50] sm:$0xff] %v367_v10  ;;  %370 = vst [vmem:[%s2026_s7 + $0x58] sm:$0xff] %v369_v11  ;;  %v371_v12 = vld [vmem:[%s2021_s6 + $0xc0] sm:$0xff]  ;;  %v373_v13 = vld [vmem:[%s2021_s6 + $0xd0] sm:$0xff] }
  0x1c   : > { %v375_v14 = vld [vmem:[%s2021_s6 + $0xe0] sm:$0xff]  ;;  %372 = vst [vmem:[%s2026_s7 + $0x60] sm:$0xff] %v371_v12  ;;  %374 = vst [vmem:[%s2026_s7 + $0x68] sm:$0xff] %v373_v13  ;;  %v377_v15 = vld [vmem:[%s2021_s6 + $0xf0] sm:$0xff] }
  0x1d   : > { %376 = vst [vmem:[%s2026_s7 + $0x70] sm:$0xff] %v375_v14  ;;  %v379_v16 = vld [vmem:[%s2021_s6 + $0x100] sm:$0xff]  ;;  %v381_v17 = vld [vmem:[%s2021_s6 + $0x110] sm:$0xff]  ;;  %378 = vst [vmem:[%s2026_s7 + $0x78] sm:$0xff] %v377_v15 }
  0x1e   : > { %380 = vst [vmem:[%s2026_s7 + $0x80] sm:$0xff] %v379_v16  ;;  %382 = vst [vmem:[%s2026_s7 + $0x88] sm:$0xff] %v381_v17  ;;  %v383_v18 = vld [vmem:[%s2021_s6 + $0x120] sm:$0xff]  ;;  %v385_v19 = vld [vmem:[%s2021_s6 + $0x130] sm:$0xff] }
  0x1f   : > { %v387_v20 = vld [vmem:[%s2021_s6 + $0x140] sm:$0xff]  ;;  %384 = vst [vmem:[%s2026_s7 + $0x90] sm:$0xff] %v383_v18  ;;  %386 = vst [vmem:[%s2026_s7 + $0x98] sm:$0xff] %v385_v19  ;;  %v389_v21 = vld [vmem:[%s2021_s6 + $0x150] sm:$0xff] }
  0x20   : > { %388 = vst [vmem:[%s2026_s7 + $0xa0] sm:$0xff] %v387_v20  ;;  %v391_v22 = vld [vmem:[%s2021_s6 + $0x160] sm:$0xff]  ;;  %v393_v23 = vld [vmem:[%s2021_s6 + $0x170] sm:$0xff]  ;;  %390 = vst [vmem:[%s2026_s7 + $0xa8] sm:$0xff] %v389_v21 }
  0x21   : > { %392 = vst [vmem:[%s2026_s7 + $0xb0] sm:$0xff] %v391_v22  ;;  %394 = vst [vmem:[%s2026_s7 + $0xb8] sm:$0xff] %v393_v23  ;;  %v395_v24 = vld [vmem:[%s2021_s6 + $0x180] sm:$0xff]  ;;  %v397_v25 = vld [vmem:[%s2021_s6 + $0x190] sm:$0xff] }
  0x22   : > { %v399_v26 = vld [vmem:[%s2021_s6 + $0x1a0] sm:$0xff]  ;;  %396 = vst [vmem:[%s2026_s7 + $0xc0] sm:$0xff] %v395_v24  ;;  %398 = vst [vmem:[%s2026_s7 + $0xc8] sm:$0xff] %v397_v25  ;;  %v401_v27 = vld [vmem:[%s2021_s6 + $0x1b0] sm:$0xff] }
  0x23   : > { %400 = vst [vmem:[%s2026_s7 + $0xd0] sm:$0xff] %v399_v26  ;;  %v403_v28 = vld [vmem:[%s2021_s6 + $0x1c0] sm:$0xff]  ;;  %v405_v29 = vld [vmem:[%s2021_s6 + $0x1d0] sm:$0xff]  ;;  %402 = vst [vmem:[%s2026_s7 + $0xd8] sm:$0xff] %v401_v27 }
  0x24   : > { %404 = vst [vmem:[%s2026_s7 + $0xe0] sm:$0xff] %v403_v28  ;;  %406 = vst [vmem:[%s2026_s7 + $0xe8] sm:$0xff] %v405_v29  ;;  %v407_v30 = vld [vmem:[%s2021_s6 + $0x1e0] sm:$0xff]  ;;  %v409_v31 = vld [vmem:[%s2021_s6 + $0x1f0] sm:$0xff] }
  0x25   : > { %v411_v32 = vld [vmem:[%s2021_s6 + $0x200] sm:$0xff]  ;;  %408 = vst [vmem:[%s2026_s7 + $0xf0] sm:$0xff] %v407_v30  ;;  %410 = vst [vmem:[%s2026_s7 + $0xf8] sm:$0xff] %v409_v31  ;;  %v413_v33 = vld [vmem:[%s2021_s6 + $0x210] sm:$0xff] }
  0x26   : > { %412 = vst [vmem:[%s2026_s7 + $0x100] sm:$0xff] %v411_v32  ;;  %v415_v34 = vld [vmem:[%s2021_s6 + $0x220] sm:$0xff]  ;;  %v417_v35 = vld [vmem:[%s2021_s6 + $0x230] sm:$0xff]  ;;  %414 = vst [vmem:[%s2026_s7 + $0x108] sm:$0xff] %v413_v33 }
  0x27   : > { %416 = vst [vmem:[%s2026_s7 + $0x110] sm:$0xff] %v415_v34  ;;  %418 = vst [vmem:[%s2026_s7 + $0x118] sm:$0xff] %v417_v35  ;;  %v419_v36 = vld [vmem:[%s2021_s6 + $0x240] sm:$0xff]  ;;  %v421_v37 = vld [vmem:[%s2021_s6 + $0x250] sm:$0xff] }
  0x28   : > { %v423_v38 = vld [vmem:[%s2021_s6 + $0x260] sm:$0xff]  ;;  %420 = vst [vmem:[%s2026_s7 + $0x120] sm:$0xff] %v419_v36  ;;  %422 = vst [vmem:[%s2026_s7 + $0x128] sm:$0xff] %v421_v37  ;;  %v425_v39 = vld [vmem:[%s2021_s6 + $0x270] sm:$0xff] }
  0x29   : > { %424 = vst [vmem:[%s2026_s7 + $0x130] sm:$0xff] %v423_v38  ;;  %v427_v40 = vld [vmem:[%s2021_s6 + $0x280] sm:$0xff]  ;;  %v429_v41 = vld [vmem:[%s2021_s6 + $0x290] sm:$0xff]  ;;  %426 = vst [vmem:[%s2026_s7 + $0x138] sm:$0xff] %v425_v39 }
  0x2a   : > { %428 = vst [vmem:[%s2026_s7 + $0x140] sm:$0xff] %v427_v40  ;;  %430 = vst [vmem:[%s2026_s7 + $0x148] sm:$0xff] %v429_v41  ;;  %v431_v42 = vld [vmem:[%s2021_s6 + $0x2a0] sm:$0xff]  ;;  %v433_v43 = vld [vmem:[%s2021_s6 + $0x2b0] sm:$0xff] }
  0x2b   : > { %v435_v44 = vld [vmem:[%s2021_s6 + $0x2c0] sm:$0xff]  ;;  %432 = vst [vmem:[%s2026_s7 + $0x150] sm:$0xff] %v431_v42  ;;  %434 = vst [vmem:[%s2026_s7 + $0x158] sm:$0xff] %v433_v43  ;;  %v437_v45 = vld [vmem:[%s2021_s6 + $0x2d0] sm:$0xff] }
  0x2c   : > { %436 = vst [vmem:[%s2026_s7 + $0x160] sm:$0xff] %v435_v44  ;;  %v439_v46 = vld [vmem:[%s2021_s6 + $0x2e0] sm:$0xff]  ;;  %v441_v47 = vld [vmem:[%s2021_s6 + $0x2f0] sm:$0xff]  ;;  %438 = vst [vmem:[%s2026_s7 + $0x168] sm:$0xff] %v437_v45 }
  0x2d   : > { %440 = vst [vmem:[%s2026_s7 + $0x170] sm:$0xff] %v439_v46  ;;  %442 = vst [vmem:[%s2026_s7 + $0x178] sm:$0xff] %v441_v47  ;;  %v443_v48 = vld [vmem:[%s2021_s6 + $0x300] sm:$0xff]  ;;  %v445_v49 = vld [vmem:[%s2021_s6 + $0x310] sm:$0xff] }
  0x2e   : > { %v447_v50 = vld [vmem:[%s2021_s6 + $0x320] sm:$0xff]  ;;  %444 = vst [vmem:[%s2026_s7 + $0x180] sm:$0xff] %v443_v48  ;;  %446 = vst [vmem:[%s2026_s7 + $0x188] sm:$0xff] %v445_v49  ;;  %v449_v51 = vld [vmem:[%s2021_s6 + $0x330] sm:$0xff] }
  0x2f   : > { %448 = vst [vmem:[%s2026_s7 + $0x190] sm:$0xff] %v447_v50  ;;  %v451_v52 = vld [vmem:[%s2021_s6 + $0x340] sm:$0xff]  ;;  %v453_v53 = vld [vmem:[%s2021_s6 + $0x350] sm:$0xff]  ;;  %450 = vst [vmem:[%s2026_s7 + $0x198] sm:$0xff] %v449_v51 }
  0x30   : > { %452 = vst [vmem:[%s2026_s7 + $0x1a0] sm:$0xff] %v451_v52  ;;  %454 = vst [vmem:[%s2026_s7 + $0x1a8] sm:$0xff] %v453_v53  ;;  %v455_v54 = vld [vmem:[%s2021_s6 + $0x360] sm:$0xff]  ;;  %v457_v55 = vld [vmem:[%s2021_s6 + $0x370] sm:$0xff] }
  0x31   : > { %v459_v56 = vld [vmem:[%s2021_s6 + $0x380] sm:$0xff]  ;;  %456 = vst [vmem:[%s2026_s7 + $0x1b0] sm:$0xff] %v455_v54  ;;  %458 = vst [vmem:[%s2026_s7 + $0x1b8] sm:$0xff] %v457_v55  ;;  %v461_v57 = vld [vmem:[%s2021_s6 + $0x390] sm:$0xff] }
  0x32   : > { %460 = vst [vmem:[%s2026_s7 + $0x1c0] sm:$0xff] %v459_v56  ;;  %v463_v58 = vld [vmem:[%s2021_s6 + $0x3a0] sm:$0xff]  ;;  %v465_v59 = vld [vmem:[%s2021_s6 + $0x3b0] sm:$0xff]  ;;  %462 = vst [vmem:[%s2026_s7 + $0x1c8] sm:$0xff] %v461_v57 }
  0x33   : > { %464 = vst [vmem:[%s2026_s7 + $0x1d0] sm:$0xff] %v463_v58  ;;  %466 = vst [vmem:[%s2026_s7 + $0x1d8] sm:$0xff] %v465_v59  ;;  %v467_v60 = vld [vmem:[%s2021_s6 + $0x3c0] sm:$0xff]  ;;  %v469_v61 = vld [vmem:[%s2021_s6 + $0x3d0] sm:$0xff] }
  0x34   : > { %v471_v62 = vld [vmem:[%s2021_s6 + $0x3e0] sm:$0xff]  ;;  %468 = vst [vmem:[%s2026_s7 + $0x1e0] sm:$0xff] %v467_v60  ;;  %470 = vst [vmem:[%s2026_s7 + $0x1e8] sm:$0xff] %v469_v61  ;;  %v473_v63 = vld [vmem:[%s2021_s6 + $0x3f0] sm:$0xff] }
  0x35   : > { %472 = vst [vmem:[%s2026_s7 + $0x1f0] sm:$0xff] %v471_v62  ;;  %474 = vst [vmem:[%s2026_s7 + $0x1f8] sm:$0xff] %v473_v63 }
  0x36 PF: > { %480 = sbr.rel (!%p1999_p3) target bundleno = 61 (0x3d), region = 62  ;;  %s482_s8 = sand.u32 (%p1999_p3), 1, %s1928_s16  }
  0x37   : > { %s1595_s9 = sshll.u32 (%p1999_p3), %s1936_s18, 3  ;;  %s1594_s10 = sshll.u32 (%p1999_p3), %s482_s8, 5 }
  0x38   : > { %s486_s13 = scalar_lea.vmem (%p1999_p3), %s2421_s2, %s1595_s9  ;;  %s484_s14 = scalar_lea.vmem (%p1999_p3), [#allocation3], %s1594_s10 }
  0x39   : > { %v520_v0 = vld [vmem:[%s486_s13] sm:$0xff] (%p1999_p3)  ;;  %v522_v1 = vld [vmem:[%s486_s13 + $0x10] sm:$0xff] (%p1999_p3) }
  0x3a   : > { %v524_v2 = vld [vmem:[%s486_s13 + $0x20] sm:$0xff] (%p1999_p3)  ;;  %521 = vst [vmem:[%s484_s14] sm:$0xff] (%p1999_p3), %v520_v0  ;;  %523 = vst [vmem:[%s484_s14 + $0x8] sm:$0xff] (%p1999_p3), %v522_v1  ;;  %v526_v3 = vld [vmem:[%s486_s13 + $0x30] sm:$0xff] (%p1999_p3) }
  0x3b   : > { %525 = vst [vmem:[%s484_s14 + $0x10] sm:$0xff] (%p1999_p3), %v524_v2  ;;  %527 = vst [vmem:[%s484_s14 + $0x18] sm:$0xff] (%p1999_p3), %v526_v3 }
  0x3d PF: > { %p1596_p8 = scmp.ge.s32.totalorder %s1940_s19, 1  ;;  %p538_p9 = scmp.lt.s32.totalorder %s1940_s19, 3 }
  0x3f   : > { %p539_p10 = pnand %p1596_p8, %p538_p9 }
  0x40   : > { %s545_s21 = sand.u32 (!%p539_p10), 1, %s1924_s15   ;;  %v2166_v4 = vld [vmem:[%s2419_s0] sm:$0xff] (!%p539_p10)  ;;  %v2176_v6 = vld [vmem:[%s2419_s0 + $0x8] sm:$0xff] (!%p539_p10)  ;;  %p595_p11 = scmp.lt.s32.totalorder (!%p539_p10), %s1932_s17, 1 }
  0x41   : > { %542 = sbr.rel (%p539_p10) target bundleno = 441 (0x1b9), region = 104  ;;  %v2171_v5 = vld [vmem:[%s2419_s0 + $0x40] sm:$0xff] (!%p539_p10)  ;;  %s1597_s30 = sshll.u32 (!%p539_p10), %s545_s21, 9  ;;  %v2185_v8 = vld [vmem:[%s2419_s0 + $0x48] sm:$0xff] (!%p539_p10) }
  0x42   : > { %v1601_v7 = vcombine.high (!%p539_p10), %v2166_v4, %v2171_v5  ;;  %v1603_v9 = vcombine.high (!%p539_p10), %v2176_v6, %v2185_v8  ;;  %s2189_s7 = scalar_lea.vmem (!%p539_p10), [#allocation2], %s1597_s30  ;;  %v819_v0 = vld [vmem:[%s2419_s0 + $0x80] sm:$0xff] (!%p539_p10)  ;;  %v1600_v1 = vcombine.low (!%p539_p10), %v2166_v4, %v2171_v5  ;;  %v1602_v2 = vcombine.low (!%p539_p10), %v2176_v6, %v2185_v8  ;;  %s1598_s23 = sshll.u32 (!%p539_p10), %s545_s21, 5 }
  0x43   : > { %v611_v10 = vld [vmem:[%s2189_s7 + $0x20] sm:$0xff] (!%p539_p10)  ;;  %v612_v20 = vld [vmem:[%s2189_s7 + $0x28] sm:$0xff] (!%p539_p10)  ;;  %v613_v32 = vld [vmem:[%s2189_s7 + $0x30] sm:$0xff] (!%p539_p10)  ;;  %s554_s29 = scalar_lea.vmem (!%p539_p10), [#allocation3], %s1598_s23  ;;  %s587_s15 = scalar_lea.vmem (!%p539_p10), [#allocation4], %s1598_s23 }
  0x44   : > { %v619_v11 = vld [vmem:[%s2189_s7 + $0x60] sm:$0xff] (!%p539_p10)  ;;  %1027 = vmatprep.mubr.bf16.mxu0 (!%p539_p10), %v1601_v7  ;;  %v679_v13 = vunpack.c.l.s8.bf16 (!%p539_p10), %v611_v10  ;;  %v680_v14 = vunpack.c.h.s8.bf16 (!%p539_p10), %v611_v10  ;;  %1076 = vmatprep.mubr.bf16.mxu1 (!%p539_p10), %v1603_v9  ;;  %v620_v21 = vld [vmem:[%s2189_s7 + $0x68] sm:$0xff] (!%p539_p10)  ;;  %v681_v24 = vunpack.c.l.s8.bf16 (!%p539_p10), %v612_v20  ;;  %v682_v30 = vunpack.c.h.s8.bf16 (!%p539_p10), %v612_v20  ;;  %v621_v33 = vld [vmem:[%s2189_s7 + $0x70] sm:$0xff] (!%p539_p10) }
  0x45   : > { %v607_v12 = vld [vmem:[%s2189_s7] sm:$0xff] (!%p539_p10)  ;;  %v695_v15 = vunpack.c.l.s8.bf16 (!%p539_p10), %v619_v11  ;;  %v696_v16 = vunpack.c.h.s8.bf16 (!%p539_p10), %v619_v11  ;;  %v697_v25 = vunpack.c.l.s8.bf16 (!%p539_p10), %v620_v21  ;;  %v608_v26 = vld [vmem:[%s2189_s7 + $0x8] sm:$0xff] (!%p539_p10)  ;;  %v698_v31 = vunpack.c.h.s8.bf16 (!%p539_p10), %v620_v21  ;;  %v609_v38 = vld [vmem:[%s2189_s7 + $0x10] sm:$0xff] (!%p539_p10) }
  0x46   : > { %v615_v17 = vld [vmem:[%s2189_s7 + $0x40] sm:$0xff] (!%p539_p10)  ;;  %v671_v18 = vunpack.c.l.s8.bf16 (!%p539_p10), %v607_v12  ;;  %1637 = vmatprep.subr.bf16.mxu0 (!%p539_p10), %v679_v13  ;;  %v672_v22 = vunpack.c.h.s8.bf16 (!%p539_p10), %v607_v12  ;;  %v616_v27 = vld [vmem:[%s2189_s7 + $0x48] sm:$0xff] (!%p539_p10)  ;;  %v673_v28 = vunpack.c.l.s8.bf16 (!%p539_p10), %v608_v26  ;;  %v674_v34 = vunpack.c.h.s8.bf16 (!%p539_p10), %v608_v26  ;;  %v617_v39 = vld [vmem:[%s2189_s7 + $0x50] sm:$0xff] (!%p539_p10) }
  0x47   : > { %v687_v19 = vunpack.c.l.s8.bf16 (!%p539_p10), %v615_v17  ;;  %1665 = vmatprep.subr.bf16.mxu1 (!%p539_p10), %v695_v15  ;;  %v688_v23 = vunpack.c.h.s8.bf16 (!%p539_p10), %v615_v17  ;;  %v689_v29 = vunpack.c.l.s8.bf16 (!%p539_p10), %v616_v27  ;;  %v690_v35 = vunpack.c.h.s8.bf16 (!%p539_p10), %v616_v27  ;;  %v614_v44 = vld [vmem:[%s2189_s7 + $0x38] sm:$0xff] (!%p539_p10)  ;;  %v627_v56 = vld [vmem:[%s2189_s7 + $0xa0] sm:$0xff] (!%p539_p10)  ;;  %v820_v7 = vld [vmem:[%s2419_s0 + $0x88] sm:$0xff] (!%p539_p10) }
  0x48   : > { %1638 = vmatpush3.bf16.msra.mxu0 %v671_v18  ;;  %v683_v36 = vunpack.c.l.s8.bf16 %v613_v32  ;;  %v699_v37 = vunpack.c.l.s8.bf16 %v621_v33  ;;  %v675_v40 = vunpack.c.l.s8.bf16 %v609_v38  ;;  %v691_v41 = vunpack.c.l.s8.bf16 %v617_v39  ;;  %v622_v45 = vld [vmem:[%s2189_s7 + $0x78] sm:$0xff]  ;;  %v635_v57 = vld [vmem:[%s2189_s7 + $0xe0] sm:$0xff]  ;;  %v828_v9 = vld [vmem:[%s2419_s0 + $0xc8] sm:$0xff]  ;;  %s596_s22 = scalar_select %p595_p11, %s1932_s17, 1 }
  0x49   : > { %1666 = vmatpush3.bf16.msra.mxu1 %v687_v19  ;;  %1639 = vmatprep.subr.bf16.mxu0 %v680_v14  ;;  %v684_v42 = vunpack.c.h.s8.bf16 %v613_v32  ;;  %v700_v43 = vunpack.c.h.s8.bf16 %v621_v33  ;;  %v676_v46 = vunpack.c.h.s8.bf16 %v609_v38  ;;  %v692_v47 = vunpack.c.h.s8.bf16 %v617_v39  ;;  %v610_v50 = vld [vmem:[%s2189_s7 + $0x18] sm:$0xff]  ;;  %v623_v62 = vld [vmem:[%s2189_s7 + $0x80] sm:$0xff]  ;;  %v628_v6 = vld [vmem:[%s2189_s7 + $0xa8] sm:$0xff]  ;;  %s1634_s21 = sshll.u32 (%p2006_p6), %s1932_s17, 3 }
  0x4a   : > { %1667 = vmatprep.subr.bf16.mxu1 %v696_v16  ;;  %v685_v48 = vunpack.c.l.s8.bf16 %v614_v44  ;;  %v701_v49 = vunpack.c.l.s8.bf16 %v622_v45  ;;  %v618_v51 = vld [vmem:[%s2189_s7 + $0x58] sm:$0xff]  ;;  %v677_v52 = vunpack.c.l.s8.bf16 %v610_v50  ;;  %v686_v54 = vunpack.c.h.s8.bf16 %v614_v44  ;;  %v631_v63 = vld [vmem:[%s2189_s7 + $0xc0] sm:$0xff]  ;;  %v636_v8 = vld [vmem:[%s2189_s7 + $0xe8] sm:$0xff]  ;;  %s597_s28 = scalar_lea.vmem %s2422_s3, %s596_s22  ;;  %s1433_s6 = scalar_lea.vmem (%p2006_p6), %s2423_s4, %s1634_s21 }
  0x4b   : > { %v693_v53 = vunpack.c.l.s8.bf16 %v618_v51  ;;  %v702_v55 = vunpack.c.h.s8.bf16 %v622_v45  ;;  %v678_v58 = vunpack.c.h.s8.bf16 %v610_v50  ;;  %v694_v59 = vunpack.c.h.s8.bf16 %v618_v51  ;;  %v827_v3 = vld [vmem:[%s2419_s0 + $0xc0] sm:$0xff]  ;;  %v624_v18 = vld [vmem:[%s2189_s7 + $0x88] sm:$0xff]  ;;  %v2234_v20 = vld [vmem:[%s2419_s0 + $0x10] sm:$0xff] }
  0x4c   : > { %1640 = vmatpush3.bf16.msra.mxu0 %v672_v22  ;;  %v711_v60 = vunpack.c.l.s8.bf16 %v627_v56  ;;  %v727_v61 = vunpack.c.l.s8.bf16 %v635_v57  ;;  %v703_v10 = vunpack.c.l.s8.bf16 %v623_v62  ;;  %v719_v11 = vunpack.c.l.s8.bf16 %v631_v63  ;;  %v632_v19 = vld [vmem:[%s2189_s7 + $0xc8] sm:$0xff]  ;;  %v625_v38 = vld [vmem:[%s2189_s7 + $0x90] sm:$0xff]  ;;  %v630_v44 = vld [vmem:[%s2189_s7 + $0xb8] sm:$0xff] }
  0x4d   : > { %1668 = vmatpush3.bf16.msra.mxu1 %v688_v23  ;;  %1641 = vmatprep.subr.bf16.mxu0 %v681_v24  ;;  %v712_v4 = vunpack.c.h.s8.bf16 %v627_v56  ;;  %v728_v5 = vunpack.c.h.s8.bf16 %v635_v57  ;;  %v1617_v12 = vcombine.high %v819_v0, %v827_v3  ;;  %v1619_v13 = vcombine.high %v820_v7, %v828_v9  ;;  %v2239_v23 = vld [vmem:[%s2419_s0 + $0x50] sm:$0xff]  ;;  %v2244_v24 = vld [vmem:[%s2419_s0 + $0x18] sm:$0xff]  ;;  %v643_v56 = vld [vmem:[%s2189_s7 + $0x120] sm:$0xff] }
  0x4e   : > { %1669 = vmatprep.subr.bf16.mxu1 %v697_v25  ;;  %v704_v14 = vunpack.c.h.s8.bf16 %v623_v62  ;;  %v720_v15 = vunpack.c.h.s8.bf16 %v631_v63  ;;  %v713_v16 = vunpack.c.l.s8.bf16 %v628_v6  ;;  %v729_v17 = vunpack.c.l.s8.bf16 %v636_v8  ;;  %v2249_v25 = vld [vmem:[%s2419_s0 + $0x58] sm:$0xff]  ;;  %v633_v39 = vld [vmem:[%s2189_s7 + $0xd0] sm:$0xff]  ;;  %v651_v57 = vld [vmem:[%s2189_s7 + $0x160] sm:$0xff] }
  0x4f   : > { %v1616_v21 = vcombine.low %v819_v0, %v827_v3  ;;  %v1618_v22 = vcombine.low %v820_v7, %v828_v9  ;;  %v705_v26 = vunpack.c.l.s8.bf16 %v624_v18  ;;  %v721_v27 = vunpack.c.l.s8.bf16 %v632_v19  ;;  %v638_v45 = vld [vmem:[%s2189_s7 + $0xf8] sm:$0xff]  ;;  %v639_v62 = vld [vmem:[%s2189_s7 + $0x100] sm:$0xff]  ;;  %v821_v0 = vld [vmem:[%s2419_s0 + $0x90] sm:$0xff] }
  0x50   : > { %1642 = vmatpush3.bf16.msra.mxu0 %v673_v28  ;;  %v714_v28 = vunpack.c.h.s8.bf16 %v628_v6  ;;  %v1605_v32 = vcombine.high %v2234_v20, %v2239_v23  ;;  %v1607_v33 = vcombine.high %v2244_v24, %v2249_v25  ;;  %v626_v50 = vld [vmem:[%s2189_s7 + $0x98] sm:$0xff]  ;;  %v647_v63 = vld [vmem:[%s2189_s7 + $0x140] sm:$0xff]  ;;  %v829_v3 = vld [vmem:[%s2419_s0 + $0xd0] sm:$0xff] }
  0x51   : > { %1670 = vmatpush3.bf16.msra.mxu1 %v689_v29  ;;  %1643 = vmatprep.subr.bf16.mxu0 %v682_v30  ;;  %v730_v29 = vunpack.c.h.s8.bf16 %v636_v8  ;;  %v629_v30 = vld [vmem:[%s2189_s7 + $0xb0] sm:$0xff]  ;;  %v634_v51 = vld [vmem:[%s2189_s7 + $0xd8] sm:$0xff]  ;;  %v1621_v6 = vcombine.high %v821_v0, %v829_v3  ;;  %v644_v8 = vld [vmem:[%s2189_s7 + $0x128] sm:$0xff] }
  0x52   : > { %1671 = vmatprep.subr.bf16.mxu1 %v698_v31  ;;  %v637_v31 = vld [vmem:[%s2189_s7 + $0xf0] sm:$0xff]  ;;  %v822_v7 = vld [vmem:[%s2419_s0 + $0x98] sm:$0xff] }
  0x53   : > { %v830_v9 = vld [vmem:[%s2419_s0 + $0xd8] sm:$0xff] }
  0x54   : > { %1644 = vmatpush3.bf16.msra.mxu0 %v674_v34  ;;  %v706_v34 = vunpack.c.h.s8.bf16 %v624_v18  ;;  %v640_v18 = vld [vmem:[%s2189_s7 + $0x108] sm:$0xff] }
  0x55   : > { %1672 = vmatpush3.bf16.msra.mxu1 %v690_v35  ;;  %1645 = vmatprep.subr.bf16.mxu0 %v683_v36  ;;  %v722_v35 = vunpack.c.h.s8.bf16 %v632_v19  ;;  %v715_v36 = vunpack.c.l.s8.bf16 %v629_v30  ;;  %v648_v19 = vld [vmem:[%s2189_s7 + $0x148] sm:$0xff] }
  0x56   : > { %1673 = vmatprep.subr.bf16.mxu1 %v699_v37  ;;  %v731_v37 = vunpack.c.l.s8.bf16 %v637_v31 }
  0x58   : > { %1646 = vmatpush3.bf16.msra.mxu0 %v675_v40  ;;  %v707_v40 = vunpack.c.l.s8.bf16 %v625_v38 }
  0x59   : > { %1674 = vmatpush3.bf16.msra.mxu1 %v691_v41  ;;  %1647 = vmatprep.subr.bf16.mxu0 %v684_v42  ;;  %v723_v41 = vunpack.c.l.s8.bf16 %v633_v39  ;;  %v716_v42 = vunpack.c.h.s8.bf16 %v629_v30  ;;  %v645_v30 = vld [vmem:[%s2189_s7 + $0x130] sm:$0xff] }
  0x5a   : > { %1675 = vmatprep.subr.bf16.mxu1 %v700_v43  ;;  %v732_v43 = vunpack.c.h.s8.bf16 %v637_v31  ;;  %v653_v31 = vld [vmem:[%s2189_s7 + $0x170] sm:$0xff] }
  0x5c   : > { %1648 = vmatpush3.bf16.msra.mxu0 %v676_v46  ;;  %v708_v46 = vunpack.c.h.s8.bf16 %v625_v38  ;;  %v641_v38 = vld [vmem:[%s2189_s7 + $0x110] sm:$0xff] }
  0x5d   : > { %1676 = vmatpush3.bf16.msra.mxu1 %v692_v47  ;;  %1649 = vmatprep.subr.bf16.mxu0 %v685_v48  ;;  %v724_v47 = vunpack.c.h.s8.bf16 %v633_v39  ;;  %v717_v48 = vunpack.c.l.s8.bf16 %v630_v44  ;;  %v649_v39 = vld [vmem:[%s2189_s7 + $0x150] sm:$0xff] }
  0x5e   : > { %1677 = vmatprep.subr.bf16.mxu1 %v701_v49  ;;  %v733_v49 = vunpack.c.l.s8.bf16 %v638_v45 }
  0x60   : > { %1650 = vmatpush3.bf16.msra.mxu0 %v677_v52  ;;  %v709_v52 = vunpack.c.l.s8.bf16 %v626_v50 }
  0x61   : > { %1678 = vmatpush3.bf16.msra.mxu1 %v693_v53  ;;  %1651 = vmatprep.subr.bf16.mxu0 %v686_v54  ;;  %v725_v53 = vunpack.c.l.s8.bf16 %v634_v51  ;;  %v718_v54 = vunpack.c.h.s8.bf16 %v630_v44  ;;  %v646_v44 = vld [vmem:[%s2189_s7 + $0x138] sm:$0xff] }
  0x62   : > { %1679 = vmatprep.subr.bf16.mxu1 %v702_v55  ;;  %v734_v55 = vunpack.c.h.s8.bf16 %v638_v45  ;;  %v654_v45 = vld [vmem:[%s2189_s7 + $0x178] sm:$0xff] }
  0x64   : > { %1652 = vmatpush3.bf16.msra.mxu0 %v678_v58  ;;  %v710_v58 = vunpack.c.h.s8.bf16 %v626_v50  ;;  %v642_v50 = vld [vmem:[%s2189_s7 + $0x118] sm:$0xff] }
  0x65   : > { %1680 = vmatpush3.bf16.msra.mxu1 %v694_v59  ;;  %1693 = vmatprep.subr.bf16.mxu0 %v711_v60  ;;  %v726_v59 = vunpack.c.h.s8.bf16 %v634_v51  ;;  %v743_v60 = vunpack.c.l.s8.bf16 %v643_v56  ;;  %v650_v51 = vld [vmem:[%s2189_s7 + $0x158] sm:$0xff] }
  0x66   : > { %1721 = vmatprep.subr.bf16.mxu1 %v727_v61  ;;  %v759_v61 = vunpack.c.l.s8.bf16 %v651_v57 }
  0x67   : > { %1028 = vmatmul.mubr.bf16.vlgmr.msra.gmra.mrb[0].mxu0 %v1600_v1  ;;  %v1604_v1 = vcombine.low %v2234_v20, %v2239_v23  ;;  %v2290_v20 = vld [vmem:[%s2419_s0 + $0x20] sm:$0xff] }
  0x68   : > { %1077 = vmatmul.mubr.bf16.vlgmr.msra.gmra.mrb[0].mxu1 %v1602_v2  ;;  %1694 = vmatpush3.bf16.msra.mxu0 %v703_v10  ;;  %v1606_v2 = vcombine.low %v2244_v24, %v2249_v25  ;;  %v735_v10 = vunpack.c.l.s8.bf16 %v639_v62  ;;  %v2295_v23 = vld [vmem:[%s2419_s0 + $0x60] sm:$0xff]  ;;  %v2300_v24 = vld [vmem:[%s2419_s0 + $0x28] sm:$0xff] }
  0x69   : > { %1722 = vmatpush3.bf16.msra.mxu1 %v719_v11  ;;  %1695 = vmatprep.subr.bf16.mxu0 %v712_v4  ;;  %v751_v11 = vunpack.c.l.s8.bf16 %v647_v63  ;;  %v744_v4 = vunpack.c.h.s8.bf16 %v643_v56  ;;  %v2305_v25 = vld [vmem:[%s2419_s0 + $0x68] sm:$0xff]  ;;  %v659_v56 = vld [vmem:[%s2189_s7 + $0x1a0] sm:$0xff] }
  0x6a   : > { %1723 = vmatprep.subr.bf16.mxu1 %v728_v5  ;;  %1035 = vmatprep.mubr.bf16.mxu0 %v1617_v12  ;;  %v760_v5 = vunpack.c.h.s8.bf16 %v651_v57  ;;  %v652_v12 = vld [vmem:[%s2189_s7 + $0x168] sm:$0xff]  ;;  %v667_v57 = vld [vmem:[%s2189_s7 + $0x1e0] sm:$0xff] }
  0x6b   : > { %1084 = vmatprep.mubr.bf16.mxu1 %v1619_v13  ;;  %v1623_v13 = vcombine.high %v822_v7, %v830_v9 }
  0x6c   : > { %1696 = vmatpush3.bf16.msra.mxu0 %v704_v14  ;;  %v736_v14 = vunpack.c.h.s8.bf16 %v639_v62  ;;  %v655_v62 = vld [vmem:[%s2189_s7 + $0x180] sm:$0xff] }
  0x6d   : > { %1724 = vmatpush3.bf16.msra.mxu1 %v720_v15  ;;  %1697 = vmatprep.subr.bf16.mxu0 %v713_v16  ;;  %v752_v15 = vunpack.c.h.s8.bf16 %v647_v63  ;;  %v745_v16 = vunpack.c.l.s8.bf16 %v644_v8  ;;  %v663_v63 = vld [vmem:[%s2189_s7 + $0x1c0] sm:$0xff] }
  0x6e   : > { %1725 = vmatprep.subr.bf16.mxu1 %v729_v17  ;;  %v761_v17 = vunpack.c.l.s8.bf16 %v652_v12 }
  0x6f   : > { %1036 = vmatmul.mubr.bf16.gmra.mrb[4].mxu0 %v1616_v21  ;;  %v1620_v21 = vcombine.low %v821_v0, %v829_v3  ;;  %v823_v0 = vld [vmem:[%s2419_s0 + $0xa0] sm:$0xff] }
  0x70   : > { %1085 = vmatmul.mubr.bf16.gmra.mrb[4].mxu1 %v1618_v22  ;;  %1698 = vmatpush3.bf16.msra.mxu0 %v705_v26  ;;  %v1622_v22 = vcombine.low %v822_v7, %v830_v9  ;;  %v737_v26 = vunpack.c.l.s8.bf16 %v640_v18  ;;  %v831_v3 = vld [vmem:[%s2419_s0 + $0xe0] sm:$0xff]  ;;  %v824_v7 = vld [vmem:[%s2419_s0 + $0xa8] sm:$0xff] }
  0x71   : > { %1726 = vmatpush3.bf16.msra.mxu1 %v721_v27  ;;  %1699 = vmatprep.subr.bf16.mxu0 %v714_v28  ;;  %v753_v27 = vunpack.c.l.s8.bf16 %v648_v19  ;;  %v746_v28 = vunpack.c.h.s8.bf16 %v644_v8  ;;  %v832_v9 = vld [vmem:[%s2419_s0 + $0xe8] sm:$0xff] }
  0x72   : > { %1727 = vmatprep.subr.bf16.mxu1 %v730_v29  ;;  %1125 = vmatprep.mubr.bf16.mxu0 %v1605_v32  ;;  %v762_v29 = vunpack.c.h.s8.bf16 %v652_v12  ;;  %v1609_v32 = vcombine.high %v2290_v20, %v2295_v23  ;;  %v660_v8 = vld [vmem:[%s2189_s7 + $0x1a8] sm:$0xff] }
  0x73   : > { %1174 = vmatprep.mubr.bf16.mxu1 %v1607_v33  ;;  %v1611_v33 = vcombine.high %v2300_v24, %v2305_v25  ;;  %v668_v12 = vld [vmem:[%s2189_s7 + $0x1e8] sm:$0xff] }
  0x74   : > { %1700 = vmatpush3.bf16.msra.mxu0 %v706_v34  ;;  %v738_v34 = vunpack.c.h.s8.bf16 %v640_v18  ;;  %v656_v18 = vld [vmem:[%s2189_s7 + $0x188] sm:$0xff] }
  0x75   : > { %1728 = vmatpush3.bf16.msra.mxu1 %v722_v35  ;;  %1701 = vmatprep.subr.bf16.mxu0 %v715_v36  ;;  %v754_v35 = vunpack.c.h.s8.bf16 %v648_v19  ;;  %v747_v36 = vunpack.c.l.s8.bf16 %v645_v30  ;;  %v664_v19 = vld [vmem:[%s2189_s7 + $0x1c8] sm:$0xff] }
  0x76   : > { %1729 = vmatprep.subr.bf16.mxu1 %v731_v37  ;;  %v763_v37 = vunpack.c.l.s8.bf16 %v653_v31 }
  0x78   : > { %1702 = vmatpush3.bf16.msra.mxu0 %v707_v40  ;;  %v739_v40 = vunpack.c.l.s8.bf16 %v641_v38 }
  0x79   : > { %1730 = vmatpush3.bf16.msra.mxu1 %v723_v41  ;;  %1703 = vmatprep.subr.bf16.mxu0 %v716_v42  ;;  %v755_v41 = vunpack.c.l.s8.bf16 %v649_v39  ;;  %v748_v42 = vunpack.c.h.s8.bf16 %v645_v30  ;;  %v661_v30 = vld [vmem:[%s2189_s7 + $0x1b0] sm:$0xff] }
  0x7a   : > { %1731 = vmatprep.subr.bf16.mxu1 %v732_v43  ;;  %v764_v43 = vunpack.c.h.s8.bf16 %v653_v31  ;;  %v669_v31 = vld [vmem:[%s2189_s7 + $0x1f0] sm:$0xff] }
  0x7c   : > { %1704 = vmatpush3.bf16.msra.mxu0 %v708_v46  ;;  %v740_v46 = vunpack.c.h.s8.bf16 %v641_v38  ;;  %v657_v38 = vld [vmem:[%s2189_s7 + $0x190] sm:$0xff] }
  0x7d   : > { %1732 = vmatpush3.bf16.msra.mxu1 %v724_v47  ;;  %1705 = vmatprep.subr.bf16.mxu0 %v717_v48  ;;  %v756_v47 = vunpack.c.h.s8.bf16 %v649_v39  ;;  %v749_v48 = vunpack.c.l.s8.bf16 %v646_v44  ;;  %v665_v39 = vld [vmem:[%s2189_s7 + $0x1d0] sm:$0xff] }
  0x7e   : > { %1733 = vmatprep.subr.bf16.mxu1 %v733_v49  ;;  %v765_v49 = vunpack.c.l.s8.bf16 %v654_v45 }
  0x80   : > { %1706 = vmatpush3.bf16.msra.mxu0 %v709_v52  ;;  %v741_v52 = vunpack.c.l.s8.bf16 %v642_v50 }
  0x81   : > { %1734 = vmatpush3.bf16.msra.mxu1 %v725_v53  ;;  %1707 = vmatprep.subr.bf16.mxu0 %v718_v54  ;;  %v757_v53 = vunpack.c.l.s8.bf16 %v650_v51  ;;  %v750_v54 = vunpack.c.h.s8.bf16 %v646_v44  ;;  %v662_v44 = vld [vmem:[%s2189_s7 + $0x1b8] sm:$0xff] }
  0x82   : > { %1735 = vmatprep.subr.bf16.mxu1 %v734_v55  ;;  %v766_v55 = vunpack.c.h.s8.bf16 %v654_v45  ;;  %v670_v45 = vld [vmem:[%s2189_s7 + $0x1f8] sm:$0xff] }
  0x84   : > { %1708 = vmatpush3.bf16.msra.mxu0 %v710_v58  ;;  %v742_v58 = vunpack.c.h.s8.bf16 %v642_v50  ;;  %v658_v50 = vld [vmem:[%s2189_s7 + $0x198] sm:$0xff] }
  0x85   : > { %1736 = vmatpush3.bf16.msra.mxu1 %v726_v59  ;;  %1749 = vmatprep.subr.bf16.mxu0 %v743_v60  ;;  %v758_v59 = vunpack.c.h.s8.bf16 %v650_v51  ;;  %v775_v60 = vunpack.c.l.s8.bf16 %v659_v56  ;;  %v666_v51 = vld [vmem:[%s2189_s7 + $0x1d8] sm:$0xff] }
  0x86   : > { %1777 = vmatprep.subr.bf16.mxu1 %v759_v61  ;;  %v791_v61 = vunpack.c.l.s8.bf16 %v667_v57 }
  0x87   : > { %1126 = vmatmul.mubr.bf16.vlgmr.msra.gmra.mrb[8].mxu0 %v1604_v1  ;;  %v1608_v1 = vcombine.low %v2290_v20, %v2295_v23  ;;  %v2346_v20 = vld [vmem:[%s2419_s0 + $0x30] sm:$0xff] }
  0x88   : > { %1175 = vmatmul.mubr.bf16.vlgmr.msra.gmra.mrb[8].mxu1 %v1606_v2  ;;  %1750 = vmatpush3.bf16.msra.mxu0 %v735_v10  ;;  %v1610_v2 = vcombine.low %v2300_v24, %v2305_v25  ;;  %v767_v10 = vunpack.c.l.s8.bf16 %v655_v62  ;;  %v2351_v23 = vld [vmem:[%s2419_s0 + $0x70] sm:$0xff]  ;;  %v2356_v24 = vld [vmem:[%s2419_s0 + $0x38] sm:$0xff] }
  0x89   : > { %1778 = vmatpush3.bf16.msra.mxu1 %v751_v11  ;;  %1751 = vmatprep.subr.bf16.mxu0 %v744_v4  ;;  %v783_v11 = vunpack.c.l.s8.bf16 %v663_v63  ;;  %v776_v4 = vunpack.c.h.s8.bf16 %v659_v56  ;;  %v2361_v25 = vld [vmem:[%s2419_s0 + $0x78] sm:$0xff]  ;;  %v774_v56 = vunpack.c.h.s8.bf16 %v658_v50 }
  0x8a   : > { %1779 = vmatprep.subr.bf16.mxu1 %v760_v5  ;;  %1133 = vmatprep.mubr.bf16.mxu0 %v1621_v6  ;;  %v792_v5 = vunpack.c.h.s8.bf16 %v667_v57  ;;  %v1625_v6 = vcombine.high %v823_v0, %v831_v3  ;;  %v790_v57 = vunpack.c.h.s8.bf16 %v666_v51 }
  0x8b   : > { %1182 = vmatprep.mubr.bf16.mxu1 %v1623_v13  ;;  %v1627_v13 = vcombine.high %v824_v7, %v832_v9 }
  0x8c   : > { %1752 = vmatpush3.bf16.msra.mxu0 %v736_v14  ;;  %v768_v14 = vunpack.c.h.s8.bf16 %v655_v62  ;;  %v1612_v62 = vcombine.low %v2346_v20, %v2351_v23 }
  0x8d   : > { %1780 = vmatpush3.bf16.msra.mxu1 %v752_v15  ;;  %1753 = vmatprep.subr.bf16.mxu0 %v745_v16  ;;  %v784_v15 = vunpack.c.h.s8.bf16 %v663_v63  ;;  %v777_v16 = vunpack.c.l.s8.bf16 %v660_v8  ;;  %v1614_v63 = vcombine.low %v2356_v24, %v2361_v25 }
  0x8e   : > { %1781 = vmatprep.subr.bf16.mxu1 %v761_v17  ;;  %v793_v17 = vunpack.c.l.s8.bf16 %v668_v12 }
  0x8f   : > { %1134 = vmatmul.mubr.bf16.gmra.mrb[12].mxu0 %v1620_v21  ;;  %v1624_v21 = vcombine.low %v823_v0, %v831_v3 }
  0x90   : > { %1183 = vmatmul.mubr.bf16.gmra.mrb[12].mxu1 %v1622_v22  ;;  %1754 = vmatpush3.bf16.msra.mxu0 %v737_v26  ;;  %v1626_v22 = vcombine.low %v824_v7, %v832_v9  ;;  %v769_v26 = vunpack.c.l.s8.bf16 %v656_v18 }
  0x91   : > { %1782 = vmatpush3.bf16.msra.mxu1 %v753_v27  ;;  %1755 = vmatprep.subr.bf16.mxu0 %v746_v28  ;;  %v785_v27 = vunpack.c.l.s8.bf16 %v664_v19  ;;  %v778_v28 = vunpack.c.h.s8.bf16 %v660_v8 }
  0x92   : > { %1783 = vmatprep.subr.bf16.mxu1 %v762_v29  ;;  %1223 = vmatprep.mubr.bf16.mxu0 %v1609_v32  ;;  %v794_v29 = vunpack.c.h.s8.bf16 %v668_v12  ;;  %v1613_v32 = vcombine.high %v2346_v20, %v2351_v23 }
  0x93   : > { %1272 = vmatprep.mubr.bf16.mxu1 %v1611_v33  ;;  %v1615_v33 = vcombine.high %v2356_v24, %v2361_v25 }
  0x94   : > { %1756 = vmatpush3.bf16.msra.mxu0 %v738_v34  ;;  %v770_v34 = vunpack.c.h.s8.bf16 %v656_v18 }
  0x95   : > { %1784 = vmatpush3.bf16.msra.mxu1 %v754_v35  ;;  %1757 = vmatprep.subr.bf16.mxu0 %v747_v36  ;;  %v786_v35 = vunpack.c.h.s8.bf16 %v664_v19  ;;  %v779_v36 = vunpack.c.l.s8.bf16 %v661_v30 }
  0x96   : > { %1785 = vmatprep.subr.bf16.mxu1 %v763_v37  ;;  %v795_v37 = vunpack.c.l.s8.bf16 %v669_v31 }
  0x98   : > { %1758 = vmatpush3.bf16.msra.mxu0 %v739_v40  ;;  %v771_v40 = vunpack.c.l.s8.bf16 %v657_v38 }
  0x99   : > { %1786 = vmatpush3.bf16.msra.mxu1 %v755_v41  ;;  %1759 = vmatprep.subr.bf16.mxu0 %v748_v42  ;;  %v787_v41 = vunpack.c.l.s8.bf16 %v665_v39  ;;  %v780_v42 = vunpack.c.h.s8.bf16 %v661_v30 }
  0x9a   : > { %1787 = vmatprep.subr.bf16.mxu1 %v764_v43  ;;  %v796_v43 = vunpack.c.h.s8.bf16 %v669_v31 }
  0x9c   : > { %1760 = vmatpush3.bf16.msra.mxu0 %v740_v46  ;;  %v772_v46 = vunpack.c.h.s8.bf16 %v657_v38 }
  0x9d   : > { %1788 = vmatpush3.bf16.msra.mxu1 %v756_v47  ;;  %1761 = vmatprep.subr.bf16.mxu0 %v749_v48  ;;  %v788_v47 = vunpack.c.h.s8.bf16 %v665_v39  ;;  %v781_v48 = vunpack.c.l.s8.bf16 %v662_v44 }
  0x9e   : > { %1789 = vmatprep.subr.bf16.mxu1 %v765_v49  ;;  %v797_v49 = vunpack.c.l.s8.bf16 %v670_v45 }
  0xa0   : > { %1762 = vmatpush3.bf16.msra.mxu0 %v741_v52  ;;  %v773_v52 = vunpack.c.l.s8.bf16 %v658_v50 }
  0xa1   : > { %1790 = vmatpush3.bf16.msra.mxu1 %v757_v53  ;;  %1763 = vmatprep.subr.bf16.mxu0 %v750_v54  ;;  %v789_v53 = vunpack.c.l.s8.bf16 %v666_v51  ;;  %v782_v54 = vunpack.c.h.s8.bf16 %v662_v44 }
  0xa2   : > { %1791 = vmatprep.subr.bf16.mxu1 %v766_v55  ;;  %v798_v55 = vunpack.c.h.s8.bf16 %v670_v45 }
  0xa4   : > { %1764 = vmatpush3.bf16.msra.mxu0 %v742_v58  ;;  %v825_v58 = vld [vmem:[%s2419_s0 + $0xb0] sm:$0xff] }
  0xa5   : > { %1792 = vmatpush3.bf16.msra.mxu1 %v758_v59  ;;  %1805 = vmatprep.subr.bf16.mxu0 %v775_v60  ;;  %v833_v59 = vld [vmem:[%s2419_s0 + $0xf0] sm:$0xff]  ;;  %v826_v60 = vld [vmem:[%s2419_s0 + $0xb8] sm:$0xff] }
  0xa6   : > { %1833 = vmatprep.subr.bf16.mxu1 %v791_v61  ;;  %v834_v61 = vld [vmem:[%s2419_s0 + $0xf8] sm:$0xff]  ;;  %v1629_v0 = vcombine.high %v825_v58, %v833_v59 }
  0xa7   : > { %1224 = vmatmul.mubr.bf16.vlgmr.msra.gmra.mrb[16].mxu0 %v1608_v1  ;;  %v1631_v1 = vcombine.high %v826_v60, %v834_v61  ;;  %v1630_v3 = vcombine.low %v826_v60, %v834_v61 }
  0xa8   : > { %1273 = vmatmul.mubr.bf16.vlgmr.msra.gmra.mrb[16].mxu1 %v1610_v2  ;;  %1806 = vmatpush3.bf16.msra.mxu0 %v767_v10  ;;  %v1628_v2 = vcombine.low %v825_v58, %v833_v59 }
  0xa9   : > { %1834 = vmatpush3.bf16.msra.mxu1 %v783_v11  ;;  %1807 = vmatprep.subr.bf16.mxu0 %v776_v4 }
  0xaa   : > { %1835 = vmatprep.subr.bf16.mxu1 %v792_v5  ;;  %1231 = vmatprep.mubr.bf16.mxu0 %v1625_v6 }
  0xab   : > { %1280 = vmatprep.mubr.bf16.mxu1 %v1627_v13 }
  0xac   : > { %1808 = vmatpush3.bf16.msra.mxu0 %v768_v14 }
  0xad   : > { %1836 = vmatpush3.bf16.msra.mxu1 %v784_v15  ;;  %1809 = vmatprep.subr.bf16.mxu0 %v777_v16 }
  0xae   : > { %1837 = vmatprep.subr.bf16.mxu1 %v793_v17 }
  0xaf   : > { %1232 = vmatmul.mubr.bf16.gmra.mrb[20].mxu0 %v1624_v21 }
  0xb0   : > { %1281 = vmatmul.mubr.bf16.gmra.mrb[20].mxu1 %v1626_v22  ;;  %1810 = vmatpush3.bf16.msra.mxu0 %v769_v26 }
  0xb1   : > { %1838 = vmatpush3.bf16.msra.mxu1 %v785_v27  ;;  %1811 = vmatprep.subr.bf16.mxu0 %v778_v28 }
  0xb2   : > { %1839 = vmatprep.subr.bf16.mxu1 %v794_v29  ;;  %1321 = vmatprep.mubr.bf16.mxu0 %v1613_v32 }
  0xb3   : > { %1370 = vmatprep.mubr.bf16.mxu1 %v1615_v33 }
  0xb4   : > { %1812 = vmatpush3.bf16.msra.mxu0 %v770_v34 }
  0xb5   : > { %1840 = vmatpush3.bf16.msra.mxu1 %v786_v35  ;;  %1813 = vmatprep.subr.bf16.mxu0 %v779_v36 }
  0xb6   : > { %1841 = vmatprep.subr.bf16.mxu1 %v795_v37 }
  0xb8   : > { %1814 = vmatpush3.bf16.msra.mxu0 %v771_v40 }
  0xb9   : > { %1842 = vmatpush3.bf16.msra.mxu1 %v787_v41  ;;  %1815 = vmatprep.subr.bf16.mxu0 %v780_v42 }
  0xba   : > { %1843 = vmatprep.subr.bf16.mxu1 %v796_v43 }
  0xbc   : > { %1816 = vmatpush3.bf16.msra.mxu0 %v772_v46 }
  0xbd   : > { %1844 = vmatpush3.bf16.msra.mxu1 %v788_v47  ;;  %1817 = vmatprep.subr.bf16.mxu0 %v781_v48 }
  0xbe   : > { %1845 = vmatprep.subr.bf16.mxu1 %v797_v49 }
  0xc0   : > { %1818 = vmatpush3.bf16.msra.mxu0 %v773_v52 }
  0xc1   : > { %1846 = vmatpush3.bf16.msra.mxu1 %v789_v53  ;;  %1819 = vmatprep.subr.bf16.mxu0 %v782_v54 }
  0xc2   : > { %1847 = vmatprep.subr.bf16.mxu1 %v798_v55 }
  0xc4   : > { %1820 = vmatpush3.bf16.msra.mxu0 %v774_v56 }
  0xc5   : > { %1848 = vmatpush3.bf16.msra.mxu1 %v790_v57 }
  0xc7   : > { %1322 = vmatmul.mubr.bf16.vlgmr.msra.gmra.mrb[24].mxu0 %v1612_v62 }
  0xc8   : > { %1371 = vmatmul.mubr.bf16.vlgmr.msra.gmra.mrb[24].mxu1 %v1614_v63  ;;  %1329 = vmatprep.mubr.bf16.mxu0 %v1629_v0 }
  0xc9   : > { %1378 = vmatprep.mubr.bf16.mxu1 %v1631_v1 }
  0xcf   : > { %1330 = vmatmul.mubr.bf16.gmra.mrb[28].mxu0 %v1628_v2 }
  0xd0   : > { %1379 = vmatmul.mubr.bf16.gmra.mrb[28].mxu1 %v1630_v3 }
 0x13a   : > { %v1653_v7 = vpop.f32.mrb[0].mxu0 }
 0x13b   : > { %v1681_v9 = vpop.f32.mrb[0].mxu1  ;;  %v1654_v10 = vpop.f32.mrb[1].mxu0 }
 0x13c   : > { %v1682_v11 = vpop.f32.mrb[1].mxu1  ;;  %v1655_v4 = vadd.f32 %v1654_v10, %v1653_v7  ;;  %v1656_v6 = vpop.f32.mrb[2].mxu0 }
 0x13d   : > { %v1683_v5 = vadd.f32 %v1682_v11, %v1681_v9  ;;  %v1684_v8 = vpop.f32.mrb[2].mxu1  ;;  %v1657_v12 = vpop.f32.mrb[3].mxu0 }
 0x13e   : > { %v1685_v13 = vpop.f32.mrb[3].mxu1  ;;  %v1658_v15 = vadd.f32 %v1657_v12, %v1656_v6 }
 0x13f   : > { %v1079_v14 = vadd.f32 %v1683_v5, %v1655_v4  ;;  %v1686_v16 = vadd.f32 %v1685_v13, %v1684_v8 }
 0x141   : > { %v1082_v17 = vadd.f32 %v1686_v16, %v1658_v15 }
 0x142   : > { %v1659_v18 = vpop.f32.mrb[4].mxu0 }
 0x143   : > { %v1687_v19 = vpop.f32.mrb[4].mxu1  ;;  %v1660_v20 = vpop.f32.mrb[5].mxu0 }
 0x144   : > { %v1688_v21 = vpop.f32.mrb[5].mxu1  ;;  %v1661_v22 = vadd.f32 %v1660_v20, %v1659_v18  ;;  %v1662_v24 = vpop.f32.mrb[6].mxu0 }
 0x145   : > { %v1689_v23 = vadd.f32 %v1688_v21, %v1687_v19  ;;  %v1690_v25 = vpop.f32.mrb[6].mxu1  ;;  %v1663_v26 = vpop.f32.mrb[7].mxu0 }
 0x146   : > { %v1691_v27 = vpop.f32.mrb[7].mxu1  ;;  %v1664_v29 = vadd.f32 %v1663_v26, %v1662_v24 }
 0x147   : > { %v1087_v28 = vadd.f32 %v1689_v23, %v1661_v22  ;;  %v1692_v30 = vadd.f32 %v1691_v27, %v1690_v25 }
 0x149   : > { %v1090_v31 = vadd.f32 %v1692_v30, %v1664_v29 }
 0x15a   : > { %v1709_v32 = vpop.f32.mrb[8].mxu0 }
 0x15b   : > { %v1737_v33 = vpop.f32.mrb[8].mxu1  ;;  %v1710_v34 = vpop.f32.mrb[9].mxu0 }
 0x15c   : > { %v1738_v35 = vpop.f32.mrb[9].mxu1  ;;  %v1711_v36 = vadd.f32 %v1710_v34, %v1709_v32  ;;  %v1712_v38 = vpop.f32.mrb[10].mxu0 }
 0x15d   : > { %v1739_v37 = vadd.f32 %v1738_v35, %v1737_v33  ;;  %v1740_v39 = vpop.f32.mrb[10].mxu1  ;;  %v1713_v40 = vpop.f32.mrb[11].mxu0 }
 0x15e   : > { %v1741_v41 = vpop.f32.mrb[11].mxu1  ;;  %v1128_v42 = vadd.f32 %v1711_v36, %v1079_v14  ;;  %v1714_v43 = vadd.f32 %v1713_v40, %v1712_v38 }
 0x15f   : > { %v1742_v44 = vadd.f32 %v1741_v41, %v1740_v39 }
 0x160   : > { %v1177_v45 = vadd.f32 %v1739_v37, %v1128_v42  ;;  %v1131_v46 = vadd.f32 %v1714_v43, %v1082_v17 }
 0x162   : > { %v1180_v47 = vadd.f32 %v1742_v44, %v1131_v46  ;;  %v1715_v48 = vpop.f32.mrb[12].mxu0 }
 0x163   : > { %v1743_v49 = vpop.f32.mrb[12].mxu1  ;;  %v1716_v50 = vpop.f32.mrb[13].mxu0 }
 0x164   : > { %v1744_v51 = vpop.f32.mrb[13].mxu1  ;;  %v1717_v52 = vadd.f32 %v1716_v50, %v1715_v48  ;;  %v1718_v53 = vpop.f32.mrb[14].mxu0 }
 0x165   : > { %v1745_v54 = vadd.f32 %v1744_v51, %v1743_v49  ;;  %v1746_v55 = vpop.f32.mrb[14].mxu1  ;;  %v1719_v56 = vpop.f32.mrb[15].mxu0  ;;  %v1398_v51 = vld [vmem:[%s554_s29] sm:$0xff] }
 0x166   : > { %v1747_v57 = vpop.f32.mrb[15].mxu1  ;;  %v1136_v58 = vadd.f32 %v1717_v52, %v1087_v28  ;;  %v1720_v59 = vadd.f32 %v1719_v56, %v1718_v53 }
 0x167   : > { %v1748_v60 = vadd.f32 %v1747_v57, %v1746_v55 }
 0x168   : > { %v1139_v61 = vadd.f32 %v1720_v59, %v1090_v31  ;;  %v1185_v62 = vadd.f32 %v1745_v54, %v1136_v58  ;;  %v1399_v59 = vld [vmem:[%s554_s29 + $0x8] sm:$0xff] }
 0x16a   : > { %v1188_v63 = vadd.f32 %v1748_v60, %v1139_v61 }
 0x17a   : > { %v1765_v0 = vpop.f32.mrb[16].mxu0 }
 0x17b   : > { %v1793_v1 = vpop.f32.mrb[16].mxu1  ;;  %v1766_v2 = vpop.f32.mrb[17].mxu0 }
 0x17c   : > { %v1794_v3 = vpop.f32.mrb[17].mxu1  ;;  %v1767_v7 = vadd.f32 %v1766_v2, %v1765_v0  ;;  %v1768_v10 = vpop.f32.mrb[18].mxu0 }
 0x17d   : > { %v1795_v9 = vadd.f32 %v1794_v3, %v1793_v1  ;;  %v1796_v11 = vpop.f32.mrb[18].mxu1  ;;  %v1769_v4 = vpop.f32.mrb[19].mxu0 }
 0x17e   : > { %v1797_v5 = vpop.f32.mrb[19].mxu1  ;;  %v1226_v6 = vadd.f32 %v1767_v7, %v1177_v45  ;;  %v1770_v8 = vadd.f32 %v1769_v4, %v1768_v10 }
 0x17f   : > { %v1798_v12 = vadd.f32 %v1797_v5, %v1796_v11  ;;  %v1400_v11 = vld [vmem:[%s554_s29 + $0x10] sm:$0xff]  ;;  %v1401_v5 = vld [vmem:[%s554_s29 + $0x18] sm:$0xff] }
 0x180   : > { %v1275_v13 = vadd.f32 %v1795_v9, %v1226_v6  ;;  %v1229_v14 = vadd.f32 %v1770_v8, %v1180_v47  ;;  %v1632_v47 = vld [vmem:[%s597_s28] ss:$0 sm:$0xff] }
 0x182   : > { %v1278_v15 = vadd.f32 %v1798_v12, %v1229_v14  ;;  %v1771_v16 = vpop.f32.mrb[20].mxu0 }
 0x183   : > { %v1799_v17 = vpop.f32.mrb[20].mxu1  ;;  %v1772_v18 = vpop.f32.mrb[21].mxu0 }
 0x184   : > { %v1800_v19 = vpop.f32.mrb[21].mxu1  ;;  %v1773_v20 = vadd.f32 %v1772_v18, %v1771_v16  ;;  %v1774_v21 = vpop.f32.mrb[22].mxu0 }
 0x185   : > { %v1801_v22 = vadd.f32 %v1800_v19, %v1799_v17  ;;  %v1802_v23 = vpop.f32.mrb[22].mxu1  ;;  %v1775_v24 = vpop.f32.mrb[23].mxu0 }
 0x186   : > { %v1803_v25 = vpop.f32.mrb[23].mxu1  ;;  %v1234_v26 = vadd.f32 %v1773_v20, %v1185_v62  ;;  %v1776_v27 = vadd.f32 %v1775_v24, %v1774_v21 }
 0x187   : > { %v1804_v28 = vadd.f32 %v1803_v25, %v1802_v23 }
 0x188   : > { %v1237_v29 = vadd.f32 %v1776_v27, %v1188_v63  ;;  %v1283_v30 = vadd.f32 %v1801_v22, %v1234_v26 }
 0x18a   : > { %v1286_v31 = vadd.f32 %v1804_v28, %v1237_v29 }
 0x19a   : > { %v1821_v32 = vpop.f32.mrb[24].mxu0 }
 0x19b   : > { %v1849_v33 = vpop.f32.mrb[24].mxu1  ;;  %v1822_v34 = vpop.f32.mrb[25].mxu0 }
 0x19c   : > { %v1850_v35 = vpop.f32.mrb[25].mxu1  ;;  %v1823_v36 = vadd.f32 %v1822_v34, %v1821_v32  ;;  %v1824_v38 = vpop.f32.mrb[26].mxu0 }
 0x19d   : > { %v1851_v37 = vadd.f32 %v1850_v35, %v1849_v33  ;;  %v1852_v39 = vpop.f32.mrb[26].mxu1  ;;  %v1825_v40 = vpop.f32.mrb[27].mxu0 }
 0x19e   : > { %v1853_v41 = vpop.f32.mrb[27].mxu1  ;;  %v1324_v42 = vadd.f32 %v1823_v36, %v1275_v13  ;;  %v1826_v43 = vadd.f32 %v1825_v40, %v1824_v38 }
 0x19f   : > { %v1854_v44 = vadd.f32 %v1853_v41, %v1852_v39 }
 0x1a0   : > { %v1373_v45 = vadd.f32 %v1851_v37, %v1324_v42  ;;  %v1327_v46 = vadd.f32 %v1826_v43, %v1278_v15 }
 0x1a2   : > { %v1376_v48 = vadd.f32 %v1854_v44, %v1327_v46  ;;  %v1827_v49 = vpop.f32.mrb[28].mxu0  ;;  %v1413_v54 = vmul.f32 %v1632_v47, %v1373_v45 }
 0x1a3   : > { %v1855_v50 = vpop.f32.mrb[28].mxu1  ;;  %v1828_v52 = vpop.f32.mrb[29].mxu0 }
 0x1a4   : > { %v1856_v53 = vpop.f32.mrb[29].mxu1  ;;  %v1829_v55 = vadd.f32 %v1828_v52, %v1827_v49  ;;  %v1830_v57 = vpop.f32.mrb[30].mxu0  ;;  %v1417_v62 = vadd.f32 %v1413_v54, %v1398_v51  ;;  %v1414_v63 = vmul.f32 %v1632_v47, %v1376_v48 }
 0x1a5   : > { %v1857_v56 = vadd.f32 %v1856_v53, %v1855_v50  ;;  %v1858_v58 = vpop.f32.mrb[30].mxu1  ;;  %v1831_v60 = vpop.f32.mrb[31].mxu0 }
 0x1a6   : > { %v1859_v61 = vpop.f32.mrb[31].mxu1  ;;  %v1332_v0 = vadd.f32 %v1829_v55, %v1283_v30  ;;  %v1832_v1 = vadd.f32 %v1831_v60, %v1830_v57  ;;  %1421 = vst [vmem:[%s587_s15] sm:$0xff] %v1417_v62  ;;  %v1418_v3 = vadd.f32 %v1414_v63, %v1399_v59 }
 0x1a7   : > { %v1860_v2 = vadd.f32 %v1859_v61, %v1858_v58 }
 0x1a8   : > { %v1381_v7 = vadd.f32 %v1857_v56, %v1332_v0  ;;  %v1335_v9 = vadd.f32 %v1832_v1, %v1286_v31  ;;  %1422 = vst [vmem:[%s587_s15 + $0x8] sm:$0xff] %v1418_v3 }
 0x1aa   : > { %v1384_v10 = vadd.f32 %v1860_v2, %v1335_v9  ;;  %v1415_v4 = vmul.f32 %v1632_v47, %v1381_v7  ;;  %1431 = sbr.rel (!%p2006_p6) target bundleno = 441 (0x1b9), region = 124 }
 0x1ac   : > { %v1419_v6 = vadd.f32 %v1415_v4, %v1400_v11  ;;  %v1416_v8 = vmul.f32 %v1632_v47, %v1384_v10 }
 0x1ad   : > { %v1467_v13 = vld [vmem:[%s587_s15] sm:$0xff] (%p2006_p6) }
 0x1ae   : > { %1423 = vst [vmem:[%s587_s15 + $0x10] sm:$0xff] %v1419_v6  ;;  %v1420_v12 = vadd.f32 %v1416_v8, %v1401_v5  ;;  %1468 = vst [vmem:[%s1433_s6] sm:$0xff] (%p2006_p6), %v1467_v13 }
 0x1af   : > { %v1469_v14 = vld [vmem:[%s587_s15 + $0x8] sm:$0xff] (%p2006_p6) }
 0x1b0   : > { %1424 = vst [vmem:[%s587_s15 + $0x18] sm:$0xff] %v1420_v12  ;;  %1470 = vst [vmem:[%s1433_s6 + $0x10] sm:$0xff] (%p2006_p6), %v1469_v14 }
 0x1b5   : > { %v1471_v15 = vld [vmem:[%s587_s15 + $0x10] sm:$0xff] }
 0x1b6   : > { %1472 = vst [vmem:[%s1433_s6 + $0x20] sm:$0xff] %v1471_v15 }
 0x1b7   : > { %v1473_v16 = vld [vmem:[%s587_s15 + $0x18] sm:$0xff] }
 0x1b8   : > { %1474 = vst [vmem:[%s1433_s6 + $0x30] sm:$0xff] %v1473_v16 }
 0x1b9 PF: > { %s14_s19 = sadd.s32 1, %s1940_s19   ;;  %s2426_s15 = smov %s1928_s16 }
 0x1ba   : > { %p11_p12 = scmp.ge.s32.totalorder %s14_s19, 4   ;;  %s2427_s16 = smov %s2011_s26 }
 0x1bb   : > { %s2428_s17 = smov %s1936_s18  ;;  %s2429_s18 = smov %s2431_s20 }
 0x1bc   :  { %13 = sbr.rel (!%p11_p12) target bundleno = 3 (0x3), region = 207 }

</bundles_post_ra>
